<compile_context>
chip_gen: v6e
topology: v6e:2x2x1
jax: 0.10.0
libtpu: 0.0.40
codegen_flags: <defaults>
</compile_context>

<pallas_src>
import functools

import jax
import jax.numpy as jnp
from jax.experimental import pallas as pl
from jax.experimental.pallas import tpu as pltpu


def _round_up(x, m):
    return (x + m - 1) // m * m


def bert_output_kernel(h_ref, res_ref, w_ref, b_ref, g_ref, beta_ref, o_ref, acc_ref):
    k = pl.program_id(1)

    @pl.when(k == 0)
    def _init():
        acc_ref[...] = jnp.zeros_like(acc_ref)

    # Matmul in the weight's compute dtype (bf16 when pre-cast), f32 accumulation.
    h = h_ref[...].astype(w_ref.dtype)
    acc_ref[...] += jnp.dot(h, w_ref[...], preferred_element_type=jnp.float32)

    @pl.when(k == pl.num_programs(1) - 1)
    def _finalize():
        # TODO(synk): dropout omitted (identity in eval mode; training-mode masking
        # would use pltpu.prng_seed / pltpu.stateful_bernoulli on x before the add).
        x = acc_ref[...] + b_ref[...].astype(jnp.float32)
        x = x + res_ref[...].astype(jnp.float32)

        # BertLayerNorm (TF style: eps inside the sqrt), reduction over last axis.
        inv_h = 1.0 / x.shape[-1]
        u = jnp.sum(x, axis=-1, keepdims=True) * inv_h
        d = x - u
        s = jnp.sum(d * d, axis=-1, keepdims=True) * inv_h
        xn = d * jax.lax.rsqrt(s + 1e-12)
        out = g_ref[...].astype(jnp.float32) * xn + beta_ref[...].astype(jnp.float32)
        o_ref[...] = out.astype(o_ref.dtype)


@functools.partial(jax.jit, static_argnames=("tm", "tk"))
def bert_output(hidden_states, input_tensor, weight_t, bias, gamma, beta,
                *, tm=256, tk=512):
    """Fused dense + bias + residual + LayerNorm.

    hidden_states: [B, S, I]
    input_tensor : [B, S, H]
    weight_t     : [I, H]  -- nn.Linear weight, pre-transposed (and ideally pre-cast
                              to bf16) ONCE at parameter-load time, outside this jit.
    bias, gamma, beta: [H]
    returns [B, S, H] in input_tensor.dtype
    """
    B, S, I = hidden_states.shape
    H = input_tensor.shape[-1]
    M = B * S

    # Row tiling: shrink tm for tiny inputs, pad rows to a multiple of tm.
    tm = min(tm, _round_up(M, 8))
    M_pad = _round_up(M, tm)
    # K tiling: stream the weight in tk x H blocks; fall back to whole I if it does
    # not divide evenly (BERT I = 3072 / 4096 divide 512; demo I = 64 -> tk = 64).
    if I % tk != 0:
        tk = I
    nk = I // tk

    h2 = hidden_states.reshape(M, I)
    r2 = input_tensor.reshape(M, H)
    if M_pad != M:
        h2 = jnp.pad(h2, ((0, M_pad - M), (0, 0)))
        r2 = jnp.pad(r2, ((0, M_pad - M), (0, 0)))

    b = bias.reshape(1, H)
    g = gamma.reshape(1, H)
    bt = beta.reshape(1, H)

    out_dtype = input_tensor.dtype
    grid = (M_pad // tm, nk)

    cost = pl.CostEstimate(
        flops=2 * M_pad * I * H,
        transcendentals=M_pad,
        bytes_accessed=(h2.size * h2.dtype.itemsize
                        + r2.size * r2.dtype.itemsize
                        + weight_t.size * weight_t.dtype.itemsize
                        + (b.size + g.size + bt.size) * 4
                        + M_pad * H * jnp.dtype(out_dtype).itemsize),
    )

    out2 = pl.pallas_call(
        bert_output_kernel,
        out_shape=jax.ShapeDtypeStruct((M_pad, H), out_dtype),
        grid_spec=pltpu.PrefetchScalarGridSpec(
            num_scalar_prefetch=0,
            grid=grid,
            in_specs=[
                pl.BlockSpec((tm, tk), lambda i, k: (i, k)),   # hidden rows x K slab
                pl.BlockSpec((tm, H), lambda i, k: (i, 0)),    # residual (revisited over k)
                pl.BlockSpec((tk, H), lambda i, k: (k, 0)),    # weight K slab
                pl.BlockSpec((1, H), lambda i, k: (0, 0)),     # dense bias
                pl.BlockSpec((1, H), lambda i, k: (0, 0)),     # LN gamma
                pl.BlockSpec((1, H), lambda i, k: (0, 0)),     # LN beta
            ],
            out_specs=pl.BlockSpec((tm, H), lambda i, k: (i, 0)),
            scratch_shapes=[pltpu.VMEM((tm, H), jnp.float32)],
        ),
        compiler_params=pltpu.CompilerParams(
            dimension_semantics=("parallel", "arbitrary"),
            vmem_limit_bytes=48 * 1024 * 1024,
        ),
        cost_estimate=cost,
    )(h2, r2, weight_t, b, g, bt)

    if M_pad != M:
        out2 = out2[:M]
    return out2.reshape(B, S, H)


def reference(hidden_states, input_tensor, weight, bias, gamma, beta):
    """Pure-f32 reference matching the PyTorch module (weight in nn.Linear [H, I] layout)."""
    x = jnp.einsum("bsi,hi->bsh", hidden_states, weight) + bias
    x = x + input_tensor
    u = jnp.mean(x, axis=-1, keepdims=True)
    s = jnp.mean((x - u) ** 2, axis=-1, keepdims=True)
    xn = (x - u) / jnp.sqrt(s + 1e-12)
    return gamma * xn + beta


if __name__ == "__main__":
    # config.intermediate_size = 64, config.hidden_size = 32
    B, S, I, H = 2, 8, 64, 32
    key = jax.random.PRNGKey(0)
    k1, k2, k3, k4 = jax.random.split(key, 4)

    hidden_states = jax.random.normal(k1, (B, S, I), dtype=jnp.float32)
    input_tensor = jax.random.normal(k2, (B, S, H), dtype=jnp.float32)

    # nn.Linear-like parameters (weight stored [H, I]), LN gamma=1, beta=0.
    weight = jax.random.normal(k3, (H, I), dtype=jnp.float32) * 0.02
    bias = jax.random.normal(k4, (H,), dtype=jnp.float32) * 0.02
    gamma = jnp.ones((H,), dtype=jnp.float32)
    beta = jnp.zeros((H,), dtype=jnp.float32)

    # "Parameter-load time": transpose once and cast to bf16 for the MXU (no per-call
    # HBM transpose, half the weight HBM/VMEM traffic).
    weight_t = jnp.asarray(weight.T, dtype=jnp.bfloat16)

    out = bert_output(hidden_states, input_tensor, weight_t, bias, gamma, beta)
    out = jax.block_until_ready(out)

    ref = reference(hidden_states, input_tensor, weight, bias, gamma, beta)
    assert out.shape == (B, S, H)
    assert out.dtype == input_tensor.dtype
    # bf16 matmul (f32 accumulation + f32 LayerNorm) vs pure-f32 reference.
    assert jnp.allclose(out, ref, atol=2e-2, rtol=2e-2), "mismatch vs reference"

    print("KERNEL_OK")
</pallas_src>

<mosaic_0001>
module attributes {stable_mosaic.version = 11 : i64} {
  func.func @bert_output_kernel(%arg0: i32, %arg1: i32, %arg2: memref<16x64xf32, #tpu.memory_space<vmem>>, %arg3: memref<16x32xf32, #tpu.memory_space<vmem>>, %arg4: memref<64x32xbf16, #tpu.memory_space<vmem>>, %arg5: memref<1x32xf32, #tpu.memory_space<vmem>>, %arg6: memref<1x32xf32, #tpu.memory_space<vmem>>, %arg7: memref<1x32xf32, #tpu.memory_space<vmem>>, %arg8: memref<16x32xf32, #tpu.memory_space<vmem>>, %arg9: memref<16x32xf32, #tpu.memory_space<vmem>>) attributes {dimension_semantics = [#tpu.dimension_semantics<parallel>, #tpu.dimension_semantics<arbitrary>], iteration_bounds = array<i64: 1, 1>, scalar_prefetch = 0 : i64, scratch_operands = 1 : i64, tpu.core_type = #tpu.core_type<tc>, window_params = [{transform_indices = @transform_0, window_bounds = array<i64: 16, 64>}, {transform_indices = @transform_1, window_bounds = array<i64: 16, 32>}, {transform_indices = @transform_2, window_bounds = array<i64: 64, 32>}, {pipeline_mode = #tpu.pipeline_mode<synchronous>, transform_indices = @transform_3, window_bounds = array<i64: 1, 32>}, {pipeline_mode = #tpu.pipeline_mode<synchronous>, transform_indices = @transform_4, window_bounds = array<i64: 1, 32>}, {pipeline_mode = #tpu.pipeline_mode<synchronous>, transform_indices = @transform_5, window_bounds = array<i64: 1, 32>}, {transform_indices = @transform_6, window_bounds = array<i64: 16, 32>}]} {
    %c0_i32 = arith.constant 0 : i32
    %0 = arith.cmpi eq, %arg1, %c0_i32 : i32
    %1 = arith.extui %0 : i1 to i32
    %c0_i32_0 = arith.constant 0 : i32
    %2 = arith.cmpi ne, %1, %c0_i32_0 : i32
    scf.if %2 {
      %cst_10 = arith.constant 0.000000e+00 : f32
      %13 = vector.broadcast %cst_10 : f32 to vector<16x32xf32>
      %c0_11 = arith.constant 0 : index
      %c0_12 = arith.constant 0 : index
      %14 = vector.load %arg9[%c0_11, %c0_12] : memref<16x32xf32, #tpu.memory_space<vmem>>, vector<16x32xf32>
      tpu.vector_store %arg9[%c0_11, %c0_12], %13 {strides = array<i32>} : memref<16x32xf32, #tpu.memory_space<vmem>>, vector<16x32xf32>,
    } else {
    }
    %c0 = arith.constant 0 : index
    %c0_1 = arith.constant 0 : index
    %3 = vector.load %arg2[%c0, %c0_1] : memref<16x64xf32, #tpu.memory_space<vmem>>, vector<16x64xf32>
    %4 = arith.truncf %3 : vector<16x64xf32> to vector<16x64xbf16>
    %c0_2 = arith.constant 0 : index
    %c0_3 = arith.constant 0 : index
    %5 = vector.load %arg9[%c0_2, %c0_3] : memref<16x32xf32, #tpu.memory_space<vmem>>, vector<16x32xf32>
    %c0_4 = arith.constant 0 : index
    %c0_5 = arith.constant 0 : index
    %6 = vector.load %arg4[%c0_4, %c0_5] : memref<64x32xbf16, #tpu.memory_space<vmem>>, vector<64x32xbf16>
    %cst = arith.constant dense<0.000000e+00> : vector<16x32xf32>
    %7 = tpu.matmul %4, %6, %cst {dimension_numbers = #tpu.dot_dimension_numbers<[1], [0], [0], [1], [0, 0, 1, 1], [], []>} : vector<16x64xbf16>, vector<64x32xbf16>, vector<16x32xf32> -> vector<16x32xf32>
    %8 = arith.addf %5, %7 : vector<16x32xf32>
    %c0_6 = arith.constant 0 : index
    %c0_7 = arith.constant 0 : index
    %9 = vector.load %arg9[%c0_6, %c0_7] : memref<16x32xf32, #tpu.memory_space<vmem>>, vector<16x32xf32>
    tpu.vector_store %arg9[%c0_6, %c0_7], %8 {strides = array<i32>} : memref<16x32xf32, #tpu.memory_space<vmem>>, vector<16x32xf32>,
    %c0_i32_8 = arith.constant 0 : i32
    %10 = arith.cmpi eq, %arg1, %c0_i32_8 : i32
    %11 = arith.extui %10 : i1 to i32
    %c0_i32_9 = arith.constant 0 : i32
    %12 = arith.cmpi ne, %11, %c0_i32_9 : i32
    scf.if %12 {
      %c0_10 = arith.constant 0 : index
      %c0_11 = arith.constant 0 : index
      %13 = vector.load %arg9[%c0_10, %c0_11] : memref<16x32xf32, #tpu.memory_space<vmem>>, vector<16x32xf32>
      %c0_12 = arith.constant 0 : index
      %c0_13 = arith.constant 0 : index
      %14 = vector.load %arg5[%c0_12, %c0_13] : memref<1x32xf32, #tpu.memory_space<vmem>>, vector<1x32xf32>
      %15 = vector.broadcast %14 : vector<1x32xf32> to vector<16x32xf32>
      %16 = arith.addf %13, %15 : vector<16x32xf32>
      %c0_14 = arith.constant 0 : index
      %c0_15 = arith.constant 0 : index
      %17 = vector.load %arg3[%c0_14, %c0_15] : memref<16x32xf32, #tpu.memory_space<vmem>>, vector<16x32xf32>
      %18 = arith.addf %16, %17 : vector<16x32xf32>
      %cst_16 = arith.constant dense<0.000000e+00> : vector<16xf32>
      %19 = vector.multi_reduction <add>, %18, %cst_16 [1] : vector<16x32xf32> to vector<16xf32>
      %20 = vector.shape_cast %19 : vector<16xf32> to vector<16x1xf32>
      %cst_17 = arith.constant 3.125000e-02 : f32
      %21 = vector.broadcast %cst_17 : f32 to vector<16x1xf32>
      %22 = arith.mulf %20, %21 : vector<16x1xf32>
      %23 = vector.broadcast %22 : vector<16x1xf32> to vector<16x32xf32>
      %24 = arith.subf %18, %23 : vector<16x32xf32>
      %25 = arith.mulf %24, %24 : vector<16x32xf32>
      %cst_18 = arith.constant dense<0.000000e+00> : vector<16xf32>
      %26 = vector.multi_reduction <add>, %25, %cst_18 [1] : vector<16x32xf32> to vector<16xf32>
      %27 = vector.shape_cast %26 : vector<16xf32> to vector<16x1xf32>
      %cst_19 = arith.constant 3.125000e-02 : f32
      %28 = vector.broadcast %cst_19 : f32 to vector<16x1xf32>
      %29 = arith.mulf %27, %28 : vector<16x1xf32>
      %cst_20 = arith.constant 9.99999996E-13 : f32
      %30 = vector.broadcast %cst_20 : f32 to vector<16x1xf32>
      %31 = arith.addf %29, %30 : vector<16x1xf32>
      %32 = math.rsqrt %31 : vector<16x1xf32>
      %33 = vector.broadcast %32 : vector<16x1xf32> to vector<16x32xf32>
      %34 = arith.mulf %24, %33 : vector<16x32xf32>
      %c0_21 = arith.constant 0 : index
      %c0_22 = arith.constant 0 : index
      %35 = vector.load %arg6[%c0_21, %c0_22] : memref<1x32xf32, #tpu.memory_space<vmem>>, vector<1x32xf32>
      %36 = vector.broadcast %35 : vector<1x32xf32> to vector<16x32xf32>
      %37 = arith.mulf %36, %34 : vector<16x32xf32>
      %c0_23 = arith.constant 0 : index
      %c0_24 = arith.constant 0 : index
      %38 = vector.load %arg7[%c0_23, %c0_24] : memref<1x32xf32, #tpu.memory_space<vmem>>, vector<1x32xf32>
      %39 = vector.broadcast %38 : vector<1x32xf32> to vector<16x32xf32>
      %40 = arith.addf %37, %39 : vector<16x32xf32>
      %c0_25 = arith.constant 0 : index
      %c0_26 = arith.constant 0 : index
      %41 = vector.load %arg8[%c0_25, %c0_26] : memref<16x32xf32, #tpu.memory_space<vmem>>, vector<16x32xf32>
      tpu.vector_store %arg8[%c0_25, %c0_26], %40 {strides = array<i32>} : memref<16x32xf32, #tpu.memory_space<vmem>>, vector<16x32xf32>,
    } else {
    }
    return
  }
  func.func @transform_0(%arg0: i32, %arg1: i32) -> (i32, i32) {
    %c0_i32 = arith.constant 0 : i32
    return %arg0, %arg1 : i32, i32
  }
  func.func @transform_1(%arg0: i32, %arg1: i32) -> (i32, i32) {
    %c0_i32 = arith.constant 0 : i32
    %c0_i32_0 = arith.constant 0 : i32
    return %arg0, %c0_i32 : i32, i32
  }
  func.func @transform_2(%arg0: i32, %arg1: i32) -> (i32, i32) {
    %c0_i32 = arith.constant 0 : i32
    %c0_i32_0 = arith.constant 0 : i32
    return %arg1, %c0_i32 : i32, i32
  }
  func.func @transform_3(%arg0: i32, %arg1: i32) -> (i32, i32) {
    %c0_i32 = arith.constant 0 : i32
    %c0_i32_0 = arith.constant 0 : i32
    %c0_i32_1 = arith.constant 0 : i32
    return %c0_i32, %c0_i32_0 : i32, i32
  }
  func.func @transform_4(%arg0: i32, %arg1: i32) -> (i32, i32) {
    %c0_i32 = arith.constant 0 : i32
    %c0_i32_0 = arith.constant 0 : i32
    %c0_i32_1 = arith.constant 0 : i32
    return %c0_i32, %c0_i32_0 : i32, i32
  }
  func.func @transform_5(%arg0: i32, %arg1: i32) -> (i32, i32) {
    %c0_i32 = arith.constant 0 : i32
    %c0_i32_0 = arith.constant 0 : i32
    %c0_i32_1 = arith.constant 0 : i32
    return %c0_i32, %c0_i32_0 : i32, i32
  }
  func.func @transform_6(%arg0: i32, %arg1: i32) -> (i32, i32) {
    %c0_i32 = arith.constant 0 : i32
    %c0_i32_0 = arith.constant 0 : i32
    return %arg0, %c0_i32 : i32, i32
  }
}

</mosaic_0001>

<bundles_post_ra>
// kernel: bert_output.1
= control target key start
LH: loop header
LB: loop body
LE: loop exit
PB: predicated region body
PF: predicated region fallthrough
CT: control target
= control target key end

     0   :  { %v259_v1 = vmov 0.0   ;;  %vm260_vm0 = vmmov 0   ;;  %vm29_vm1 = vcmask 261120   ;;  %s345_s0 = inlined_call_operand.vmem [shape: f32[16,64], index: 0, kind: input, shape index: {}]   ;;  %s346_s1 = inlined_call_operand.vmem [shape: f32[16,32], index: 1, kind: input, shape index: {}]   ;;  %s347_s2 = inlined_call_operand.vmem [shape: bf16[64,32], index: 2, kind: input, shape index: {}]   ;;  %s348_s3 = inlined_call_operand.vmem [shape: f32[1,32], index: 3, kind: input, shape index: {}]   ;;  %s349_s4 = inlined_call_operand.vmem [shape: f32[1,32], index: 4, kind: input, shape index: {}]   ;;  %s350_s5 = inlined_call_operand.vmem [shape: f32[1,32], index: 5, kind: input, shape index: {}]   ;;  %s351_s6 = inlined_call_operand.hbm [shape: f32[16,32], index: 6, kind: output, shape index: {}]  }
   0x1   :  { %v229_v0 = vld [vmem:[%s347_s2 + $0x18] sm:$0xff]   ;;  %212 = vmatprep.subr.bf16.mxu0 %v259_v1  ;;  %v230_v2 = vld [vmem:[%s347_s2 + $0x10] sm:$0xff]   ;;  %220 = vmatprep.mubr.msk.bf16.mxu0 %vm260_vm0, %v259_v1  ;;  %30 = vst.msk [vmem:[#allocation2] sm:$0xff] %vm29_vm1, %v259_v1  ;;  %31 = vst.msk [vmem:[#allocation2 + $0x8] sm:$0xff] %vm29_vm1, %v259_v1 }
   0x2   :  { %213 = vmatpush3.bf16.msra.mxu0 %v229_v0 }
   0x3   :  { %214 = vmatprep.subr.bf16.mxu0 %v259_v1 }
   0x4   :  { %11 = vsyncpa [#allocation4], 0  ;;  %v231_v3 = vld [vmem:[%s347_s2 + $0x8] sm:$0xff]   ;;  %v232_v4 = vld [vmem:[%s347_s2] sm:$0xff]   ;;  %vm69_vm2 = vcmask 523264   ;;  %s261_s15 = smov [#allocation3]  }
   0x5   :  { %v32_v5 = vld [vmem:[%s345_s0] sm:$0xff]  ;;  %v33_v6 = vld [vmem:[%s345_s0 + $0x8] sm:$0xff]  ;;  %s188_s16 = sshll.u32 %s261_s15, 4  ;;  %s189_s16 = int_to_ptr.vmem [resolvable:$true] %s188_s16 }
   0x6   :  { %215 = vmatpush3.bf16.msra.mxu0 %v230_v2  ;;  %v34_v7 = vpack.c.bf16 %v33_v6, %v32_v5  ;;  %v204_v16 = vld [vmem:[%s348_s3] ss:$0 sm:$0xff]  ;;  %v134_v22 = vld [vmem:[%s346_s1 + $0x8] sm:$0xff]  ;;  %s237_s17 = scalar_lea.vmem %s189_s16, 256  ;;  %p242_p1 = scmp.lt.s32.totalorder %s189_s16, %s189_s16 }
   0x7   :  { %216 = vmatprep.subr.bf16.mxu0 %v259_v1  ;;  %v133_v18 = vld [vmem:[%s346_s1] sm:$0xff]  ;;  %p238_p0 = scmp.ne.s32.totalorder %s189_s16, %s237_s17  ;;  %p243_p2 = scmp.lt.s32.totalorder %s237_s17, %s237_s17 }
   0x8   :  { %v35_v8 = vld [vmem:[#allocation2] sm:$0xff]  ;;  %v36_v12 = vld [vmem:[#allocation2 + $0x8] sm:$0xff] }
   0x9   :  { %v205_v44 = vld [vmem:[%s349_s4] ss:$0 sm:$0xff]  ;;  %p244_p3 = por %p243_p2, %p242_p1 }
   0xa   :  { %217 = vmatpush3.bf16.msra.mxu0 %v231_v3  ;;  %v206_v46 = vld [vmem:[%s350_s5] ss:$0 sm:$0xff] }
   0xb   :  { %218 = vmatprep.subr.bf16.mxu0 %v259_v1  ;;  %p245_p4 = pnand %p244_p3, %p238_p0 }
   0xe   :  { %219 = vmatpush3.bf16.msra.mxu0 %v232_v4 }
  0x11   :  { %221 = vmatmul.mubr.msk.bf16.vlgmr.msra.gmra.mxu0 %vm69_vm2, %v34_v7 }
  0xd1   :  { %v107_v9 = vpop.f32.mrf.mxu0 }
  0xd2   :  { %v114_v10 = vadd.f32 %v107_v9, %v35_v8 }
  0xd3   :  { %v222_v11 = vpop.f32.mrf.mxu0 }
  0xd4   :  { %117 = vst.msk [vmem:[#allocation2] sm:$0xff] %vm29_vm1, %v114_v10 }
  0xd5   :  { %v110_v13 = vpop.f32.mrf.mxu0 }
  0xd6   :  { %v115_v14 = vadd.f32 %v110_v13, %v36_v12 }
  0xd7   :  { %v223_v15 = vpop.f32.mrf.mxu0 }
  0xd8   :  { %118 = vst.msk [vmem:[#allocation2 + $0x8] sm:$0xff] %vm29_vm1, %v115_v14 }
  0xdb   :  { %v122_v17 = vld [vmem:[#allocation2] sm:$0xff] }
  0xdc   :  { %v131_v19 = vadd.f32 %v204_v16, %v122_v17 }
  0xde   :  { %v135_v20 = vadd.f32 %v133_v18, %v131_v19 }
  0xdf   :  { %v123_v21 = vld [vmem:[#allocation2 + $0x8] sm:$0xff] }
  0xe0   :  { %v137_v23 = vsel %vm29_vm1, %v135_v20, 0.0  ;;  %v132_v24 = vadd.f32 %v204_v16, %v123_v21 }
  0xe1   :  { %138 = vadd.xlane.f32.xlu0 %v137_v23 }
  0xe2   :  { %v136_v25 = vadd.f32 %v134_v22, %v132_v24 }
  0xe4   :  { %v140_v26 = vsel %vm29_vm1, %v136_v25, 0.0 }
  0xe5   :  { %141 = vadd.xlane.f32.xlu0 %v140_v26 }
 0x16a   :  { %v139_v27 = vpop.xlane.xlu0 %138 }
 0x16b   :  { %v143_v28 = vmul.f32 0.03125, %v139_v27 }
 0x16d   :  { %v145_v29 = vsub.f32 %v135_v20, %v143_v28 }
 0x16e   :  { %v142_v30 = vpop.xlane.xlu0 %141 }
 0x16f   :  { %v144_v31 = vmul.f32 0.03125, %v142_v30  ;;  %v147_v32 = vmul.f32 %v145_v29, %v145_v29 }
 0x171   :  { %v146_v33 = vsub.f32 %v136_v25, %v144_v31  ;;  %v149_v34 = vsel %vm29_vm1, %v147_v32, 0.0 }
 0x172   :  { %150 = vadd.xlane.f32.xlu1 %v149_v34 }
 0x173   :  { %v148_v35 = vmul.f32 %v146_v33, %v146_v33 }
 0x175   :  { %v152_v36 = vsel %vm29_vm1, %v148_v35, 0.0 }
 0x176   :  { %153 = vadd.xlane.f32.xlu1 %v152_v36 }
 0x1fb   :  { %v151_v37 = vpop.xlane.xlu1 %150 }
 0x1fc   :  { %v155_v38 = vmul.f32 0.03125, %v151_v37 }
 0x1fe   :  { %v157_v39 = vadd.f32 1e-12, %v155_v38 }
 0x1ff   :  { %v154_v40 = vpop.xlane.xlu1 %153 }
 0x200   :  { %233 = vrsqrt.f32 %v157_v39  ;;  %v156_v41 = vmul.f32 0.03125, %v154_v40 }
 0x202   :  { %v158_v42 = vadd.f32 1e-12, %v156_v41 }
 0x204   :  { %235 = vrsqrt.f32 %v158_v42 }
 0x20d   :  { %v234_v43 = vpop.eup %233 }
 0x20e   :  { %v161_v45 = vmul.f32 %v234_v43, %v145_v29 }
 0x210   :  { %v170_v47 = vmul.f32 %v205_v44, %v161_v45 }
 0x211   :  { %v236_v48 = vpop.eup %235 }
 0x212   :  { %v162_v49 = vmul.f32 %v236_v48, %v146_v33  ;;  %v179_v50 = vadd.f32 %v206_v46, %v170_v47 }
 0x214   :  { %v171_v51 = vmul.f32 %v205_v44, %v162_v49  ;;  %181 = vst.msk [vmem:[#allocation3] sm:$0xff] %vm29_vm1, %v179_v50 }
 0x216   :  { %v180_v52 = vadd.f32 %v206_v46, %v171_v51 }
 0x218   :  { %182 = vst.msk [vmem:[#allocation3 + $0x8] sm:$0xff] %vm29_vm1, %v180_v52 }
 0x219   :  { %248 = shalt.err (!%p245_p4)
}
 0x21a   :  { %s262_s4 = smov 128   ;;  %s263_s5 = smov 8  }
 0x21b   :  { %194 = dma.vmem_to_hbm [thread:$0]  %s189_s16, 256, %s351_s6, [#allocation4], %s262_s4, %s262_s4, %s263_s5  }
 0x21c   :  { %257 = dma.done.wait [#allocation4], 256  }
 0x21d   :  { %258 = vsyncadd [#allocation4], 4294967040 }
 0x21e   :  { %198 = vsyncpa [#allocation4], 1 }

</bundles_post_ra>
